<compile_context>
chip_gen: v7x
topology: tpu7x:2x2x1
jax: 0.10.0
libtpu: 0.0.40
codegen_flags: <defaults>
</compile_context>

<pallas_src>
import functools

import jax
import jax.numpy as jnp
from jax.experimental import pallas as pl
from jax.experimental.pallas import tpu as pltpu

# Hyperparameters consistent with the module's __init__
WORD_SIZE = 50        # vocab size
EMB_NUM = 32          # embedding dim
RNN_HIDDEN_NUM = 32   # rnn hidden dim
CLASS_NUM = 4         # number of classes
BATCH = 2
SEQ = 8

BP = 8                # batch padded to one full sublane group
VOCAB_PAD = 128       # vocab padded to one full lane group (one-hot gather is lane-dense)
CLASS_PAD = 128       # classes padded to one full lane group (lane-dense output store)


def _rnn_text_cls_kernel(ids_ref, lab_ref, emb_ref, w_ih_ref, w_hh_ref, b_rnn_ref,
                         w_cls_ref, b_cls_ref, out_ref, *, seq_len, batch, num_classes):
    """ids_ref:  [T*8, 1] int32 (time-major, batch padded to 8, clamped to [0, vocab))
       lab_ref:  [8, 1]   int32 (labels, padded rows = -1)
       emb_ref:  [128, E] bf16  (vocab-padded embedding table)
       w_*_ref:  bf16 weights (pre-transposed for x @ W), b_* f32 biases
       out_ref:  [8, 128] f32   lanes [0:C]=logits, lane C=mean CE loss, lane C+1=argmax"""
    TB = ids_ref.shape[0]                      # T * 8
    v_pad, _ = emb_ref.shape

    # ---- vectorized embedding gather on the MXU (one VPU compare + one matmul) ----
    ids = ids_ref[...]                                                     # [T*8, 1] int32
    vocab_lane = jax.lax.broadcasted_iota(jnp.int32, (TB, v_pad), 1)
    one_hot = (vocab_lane == ids).astype(jnp.bfloat16)                     # [T*8, 128]
    x = jnp.dot(one_hot, emb_ref[...], preferred_element_type=jnp.float32)  # [T*8, E] f32

    # ---- hoisted input projection: one MXU call + one bias broadcast for all timesteps ----
    xw = (jnp.dot(x.astype(jnp.bfloat16), w_ih_ref[...],
                  preferred_element_type=jnp.float32)
          + b_rnn_ref[...])                                                # [T*8, H], b = b_ih+b_hh

    # ---- serial tanh recurrence: h stays in vregs, fully unrolled, 8-sublane-aligned slices ----
    w_hh = w_hh_ref[...]
    h = jnp.zeros((BP, w_hh.shape[0]), dtype=jnp.float32)
    for t in range(seq_len):
        xw_t = xw[t * BP:(t + 1) * BP, :]                                  # aligned static slice
        h = jnp.tanh(xw_t + jnp.dot(h.astype(jnp.bfloat16), w_hh,
                                    preferred_element_type=jnp.float32))

    # ---- classifier on last hidden state, lane-padded to 128 classes ----
    logits = (jnp.dot(h.astype(jnp.bfloat16), w_cls_ref[...],
                      preferred_element_type=jnp.float32)
              + b_cls_ref[...])                                            # [8, 128]

    # ---- fused argmax + mean cross-entropy over the valid class lanes ----
    lane = jax.lax.broadcasted_iota(jnp.int32, logits.shape, 1)
    valid = lane < num_classes
    masked = jnp.where(valid, logits, jnp.float32(-1e30))
    row_max = jnp.max(masked, axis=-1, keepdims=True)                      # [8, 1]
    # argmax = smallest valid lane achieving the row max (matches first-index semantics)
    pred = jnp.min(jnp.where(masked == row_max, lane, CLASS_PAD),
                   axis=-1, keepdims=True).astype(jnp.float32)             # [8, 1]
    # log-softmax over valid lanes
    p = jnp.where(valid, jnp.exp(masked - row_max), 0.0)
    lse = row_max + jnp.log(jnp.sum(p, axis=-1, keepdims=True))
    logp = masked - lse
    # label one-hot gather; padded rows (label == -1) contribute zero
    labels = lab_ref[...]                                                  # [8, 1]
    nll = -jnp.sum(jnp.where(lane == labels, logp, 0.0), axis=-1, keepdims=True)
    loss = jnp.sum(nll) * (1.0 / batch)

    # ---- single lane-dense, unmasked store packing logits / loss / argmax ----
    slab = jnp.where(valid, logits, 0.0)
    slab = jnp.where(lane == num_classes, loss, slab)
    slab = jnp.where(lane == num_classes + 1, pred, slab)
    out_ref[...] = slab


def _run_kernel(params, ids, labels):
    """Runs the fused kernel; returns the packed (8, 128) output slab."""
    B, T = ids.shape
    # clamp ids (VMEM indexing / one-hot has no bounds check) and lay out time-major, batch->8
    ids = jnp.clip(ids.astype(jnp.int32), 0, WORD_SIZE - 1)
    ids_tm = jnp.pad(jnp.transpose(ids), ((0, 0), (0, BP - B)))            # [T, 8]
    ids_col = ids_tm.reshape(T * BP, 1)
    lab_col = jnp.pad(labels.astype(jnp.int32), (0, BP - B),
                      constant_values=-1).reshape(BP, 1)

    kernel = functools.partial(_rnn_text_cls_kernel,
                               seq_len=T, batch=B, num_classes=CLASS_NUM)
    return pl.pallas_call(
        kernel,
        out_shape=jax.ShapeDtypeStruct((BP, CLASS_PAD), jnp.float32),
        in_specs=[pl.BlockSpec(memory_space=pltpu.MemorySpace.VMEM)] * 8,
        out_specs=pl.BlockSpec(memory_space=pltpu.MemorySpace.VMEM),
    )(ids_col, lab_col, params["emb_pad"], params["w_ih_t"], params["w_hh_t"],
      params["b_rnn"], params["w_cls_pad"], params["b_cls_pad"])


def forward(params, x, label=None):
    """Mirrors RnnTextCls.forward: CE loss if label is given, else argmax class ids."""
    B = x.shape[0]
    lab = label if label is not None else jnp.full((B,), -1, jnp.int32)
    slab = _run_kernel(params, x, lab)
    if label is not None:
        return slab[0, CLASS_NUM]                            # fused mean cross-entropy
    return slab[:B, CLASS_NUM + 1].astype(jnp.int32)         # fused argmax


def init_params(key):
    """Deterministic synthetic parameters (PyTorch-style uniform init), kernel-ready layout."""
    ks = jax.random.split(key, 7)
    k = 1.0 / jnp.sqrt(RNN_HIDDEN_NUM)
    emb = jax.random.normal(ks[0], (WORD_SIZE, EMB_NUM), jnp.float32)
    w_ih_t = jax.random.uniform(ks[1], (EMB_NUM, RNN_HIDDEN_NUM), jnp.float32, -k, k)
    w_hh_t = jax.random.uniform(ks[2], (RNN_HIDDEN_NUM, RNN_HIDDEN_NUM), jnp.float32, -k, k)
    b_rnn = (jax.random.uniform(ks[3], (1, RNN_HIDDEN_NUM), jnp.float32, -k, k)
             + jax.random.uniform(ks[4], (1, RNN_HIDDEN_NUM), jnp.float32, -k, k))
    w_cls_t = jax.random.uniform(ks[5], (RNN_HIDDEN_NUM, CLASS_NUM), jnp.float32, -k, k)
    b_cls = jax.random.uniform(ks[6], (1, CLASS_NUM), jnp.float32, -k, k)

    # kernel-ready: vocab padded to 128 rows, classes padded to 128 lanes,
    # MXU operands pre-cast to bf16 (f32 accumulation + f32 elementwise inside the kernel)
    emb_pad = jnp.zeros((VOCAB_PAD, EMB_NUM), jnp.float32).at[:WORD_SIZE].set(emb)
    w_cls_pad = jnp.zeros((RNN_HIDDEN_NUM, CLASS_PAD), jnp.float32).at[:, :CLASS_NUM].set(w_cls_t)
    b_cls_pad = jnp.zeros((1, CLASS_PAD), jnp.float32).at[:, :CLASS_NUM].set(b_cls)
    return {
        "emb_pad": emb_pad.astype(jnp.bfloat16),
        "w_ih_t": w_ih_t.astype(jnp.bfloat16),
        "w_hh_t": w_hh_t.astype(jnp.bfloat16),
        "b_rnn": b_rnn,                                    # f32, b_ih + b_hh folded
        "w_cls_pad": w_cls_pad.astype(jnp.bfloat16),
        "b_cls_pad": b_cls_pad,                            # f32
    }


def _forward_reference(params, x, label):
    """Pure-JAX reference replicating the kernel's bf16 MXU operand casts."""
    ids = jnp.clip(x.astype(jnp.int32), 0, WORD_SIZE - 1)
    emb_f32 = params["emb_pad"].astype(jnp.float32)
    w_ih = params["w_ih_t"].astype(jnp.float32)
    w_hh = params["w_hh_t"].astype(jnp.float32)
    w_cls = params["w_cls_pad"].astype(jnp.float32)[:, :CLASS_NUM]
    b_cls = params["b_cls_pad"][:, :CLASS_NUM]
    xemb = emb_f32[ids]                                                   # [B, T, E]
    h = jnp.zeros((x.shape[0], RNN_HIDDEN_NUM), jnp.float32)
    for t in range(x.shape[1]):
        h = jnp.tanh(xemb[:, t] @ w_ih + params["b_rnn"]
                     + h.astype(jnp.bfloat16).astype(jnp.float32) @ w_hh)
    logits = h.astype(jnp.bfloat16).astype(jnp.float32) @ w_cls + b_cls
    logp = jax.nn.log_softmax(logits, axis=-1)
    loss = -jnp.mean(jnp.take_along_axis(logp, label[:, None], axis=-1))
    return logits, loss


if __name__ == "__main__":
    key = jax.random.PRNGKey(0)
    k_x, k_lbl, k_param = jax.random.split(key, 3)

    params = init_params(k_param)
    x = jax.random.randint(k_x, (BATCH, SEQ), 0, WORD_SIZE, dtype=jnp.int32)
    label = jax.random.randint(k_lbl, (BATCH,), 0, CLASS_NUM, dtype=jnp.int32)

    predict = jax.jit(lambda p, xx: forward(p, xx))
    loss_fn = jax.jit(lambda p, xx, ll: forward(p, xx, ll))

    # Inference path: argmax class ids
    pred = predict(params, x)
    jax.block_until_ready(pred)

    # Training path: mean cross-entropy loss
    loss = loss_fn(params, x, label)
    jax.block_until_ready(loss)

    assert pred.shape == (BATCH,)
    assert loss.shape == ()
    assert bool(jnp.isfinite(loss))

    # Numerical check against a pure-JAX reference (same bf16 operand casts)
    slab = jax.jit(_run_kernel)(params, x, label)
    jax.block_until_ready(slab)
    logits_ref, loss_ref = _forward_reference(params, x, label)
    assert float(jnp.max(jnp.abs(slab[:BATCH, :CLASS_NUM] - logits_ref))) < 1e-2
    assert float(jnp.abs(slab[0, CLASS_NUM] - loss_ref)) < 1e-2
    assert jnp.all(pred >= 0) and jnp.all(pred < CLASS_NUM)

    print("KERNEL_OK")
</pallas_src>

<mosaic_0001>
module attributes {stable_mosaic.version = 11 : i64} {
  func.func @_rnn_text_cls_kernel(%arg0: memref<64x1xi32, #tpu.memory_space<vmem>>, %arg1: memref<8x1xi32, #tpu.memory_space<vmem>>, %arg2: memref<128x32xbf16, #tpu.memory_space<vmem>>, %arg3: memref<32x32xbf16, #tpu.memory_space<vmem>>, %arg4: memref<32x32xbf16, #tpu.memory_space<vmem>>, %arg5: memref<1x32xf32, #tpu.memory_space<vmem>>, %arg6: memref<32x128xbf16, #tpu.memory_space<vmem>>, %arg7: memref<1x128xf32, #tpu.memory_space<vmem>>, %arg8: memref<8x128xf32, #tpu.memory_space<vmem>>) attributes {dimension_semantics = [], scalar_prefetch = 0 : i64, scratch_operands = 0 : i64, tpu.core_type = #tpu.core_type<tc>} {
    %c0 = arith.constant 0 : index
    %c0_0 = arith.constant 0 : index
    %0 = vector.load %arg0[%c0, %c0_0] : memref<64x1xi32, #tpu.memory_space<vmem>>, vector<64x1xi32>
    %1 = tpu.iota {dimensions = array<i32: 1>} : vector<64x128xi32>
    %2 = vector.broadcast %0 : vector<64x1xi32> to vector<64x128xi32>
    %3 = arith.cmpi eq, %1, %2 : vector<64x128xi32>
    %4 = arith.extui %3 : vector<64x128xi1> to vector<64x128xi32>
    %5 = arith.sitofp %4 : vector<64x128xi32> to vector<64x128xf32>
    %6 = arith.truncf %5 : vector<64x128xf32> to vector<64x128xbf16>
    %c0_1 = arith.constant 0 : index
    %c0_2 = arith.constant 0 : index
    %7 = vector.load %arg2[%c0_1, %c0_2] : memref<128x32xbf16, #tpu.memory_space<vmem>>, vector<128x32xbf16>
    %cst = arith.constant dense<0.000000e+00> : vector<64x32xf32>
    %8 = tpu.matmul %6, %7, %cst {dimension_numbers = #tpu.dot_dimension_numbers<[1], [0], [0], [1], [0, 0, 1, 1], [], []>} : vector<64x128xbf16>, vector<128x32xbf16>, vector<64x32xf32> -> vector<64x32xf32>
    %9 = arith.truncf %8 : vector<64x32xf32> to vector<64x32xbf16>
    %c0_3 = arith.constant 0 : index
    %c0_4 = arith.constant 0 : index
    %10 = vector.load %arg3[%c0_3, %c0_4] : memref<32x32xbf16, #tpu.memory_space<vmem>>, vector<32x32xbf16>
    %cst_5 = arith.constant dense<0.000000e+00> : vector<64x32xf32>
    %11 = tpu.matmul %9, %10, %cst_5 {dimension_numbers = #tpu.dot_dimension_numbers<[1], [0], [0], [1], [0, 0, 1, 1], [], []>} : vector<64x32xbf16>, vector<32x32xbf16>, vector<64x32xf32> -> vector<64x32xf32>
    %c0_6 = arith.constant 0 : index
    %c0_7 = arith.constant 0 : index
    %12 = vector.load %arg5[%c0_6, %c0_7] : memref<1x32xf32, #tpu.memory_space<vmem>>, vector<1x32xf32>
    %13 = vector.broadcast %12 : vector<1x32xf32> to vector<64x32xf32>
    %14 = arith.addf %11, %13 : vector<64x32xf32>
    %c0_8 = arith.constant 0 : index
    %c0_9 = arith.constant 0 : index
    %15 = vector.load %arg4[%c0_8, %c0_9] : memref<32x32xbf16, #tpu.memory_space<vmem>>, vector<32x32xbf16>
    %cst_10 = arith.constant 0.000000e+00 : f32
    %16 = vector.broadcast %cst_10 : f32 to vector<8x32xf32>
    %17 = vector.extract_strided_slice %14 {offsets = [0, 0], sizes = [8, 32], strides = [1, 1]} : vector<64x32xf32> to vector<8x32xf32>
    %18 = arith.truncf %16 : vector<8x32xf32> to vector<8x32xbf16>
    %cst_11 = arith.constant dense<0.000000e+00> : vector<8x32xf32>
    %19 = tpu.matmul %18, %15, %cst_11 {dimension_numbers = #tpu.dot_dimension_numbers<[1], [0], [0], [1], [0, 0, 1, 1], [], []>} : vector<8x32xbf16>, vector<32x32xbf16>, vector<8x32xf32> -> vector<8x32xf32>
    %20 = arith.addf %17, %19 : vector<8x32xf32>
    %21 = math.tanh %20 : vector<8x32xf32>
    %22 = vector.extract_strided_slice %14 {offsets = [8, 0], sizes = [8, 32], strides = [1, 1]} : vector<64x32xf32> to vector<8x32xf32>
    %23 = arith.truncf %21 : vector<8x32xf32> to vector<8x32xbf16>
    %cst_12 = arith.constant dense<0.000000e+00> : vector<8x32xf32>
    %24 = tpu.matmul %23, %15, %cst_12 {dimension_numbers = #tpu.dot_dimension_numbers<[1], [0], [0], [1], [0, 0, 1, 1], [], []>} : vector<8x32xbf16>, vector<32x32xbf16>, vector<8x32xf32> -> vector<8x32xf32>
    %25 = arith.addf %22, %24 : vector<8x32xf32>
    %26 = math.tanh %25 : vector<8x32xf32>
    %27 = vector.extract_strided_slice %14 {offsets = [16, 0], sizes = [8, 32], strides = [1, 1]} : vector<64x32xf32> to vector<8x32xf32>
    %28 = arith.truncf %26 : vector<8x32xf32> to vector<8x32xbf16>
    %cst_13 = arith.constant dense<0.000000e+00> : vector<8x32xf32>
    %29 = tpu.matmul %28, %15, %cst_13 {dimension_numbers = #tpu.dot_dimension_numbers<[1], [0], [0], [1], [0, 0, 1, 1], [], []>} : vector<8x32xbf16>, vector<32x32xbf16>, vector<8x32xf32> -> vector<8x32xf32>
    %30 = arith.addf %27, %29 : vector<8x32xf32>
    %31 = math.tanh %30 : vector<8x32xf32>
    %32 = vector.extract_strided_slice %14 {offsets = [24, 0], sizes = [8, 32], strides = [1, 1]} : vector<64x32xf32> to vector<8x32xf32>
    %33 = arith.truncf %31 : vector<8x32xf32> to vector<8x32xbf16>
    %cst_14 = arith.constant dense<0.000000e+00> : vector<8x32xf32>
    %34 = tpu.matmul %33, %15, %cst_14 {dimension_numbers = #tpu.dot_dimension_numbers<[1], [0], [0], [1], [0, 0, 1, 1], [], []>} : vector<8x32xbf16>, vector<32x32xbf16>, vector<8x32xf32> -> vector<8x32xf32>
    %35 = arith.addf %32, %34 : vector<8x32xf32>
    %36 = math.tanh %35 : vector<8x32xf32>
    %37 = vector.extract_strided_slice %14 {offsets = [32, 0], sizes = [8, 32], strides = [1, 1]} : vector<64x32xf32> to vector<8x32xf32>
    %38 = arith.truncf %36 : vector<8x32xf32> to vector<8x32xbf16>
    %cst_15 = arith.constant dense<0.000000e+00> : vector<8x32xf32>
    %39 = tpu.matmul %38, %15, %cst_15 {dimension_numbers = #tpu.dot_dimension_numbers<[1], [0], [0], [1], [0, 0, 1, 1], [], []>} : vector<8x32xbf16>, vector<32x32xbf16>, vector<8x32xf32> -> vector<8x32xf32>
    %40 = arith.addf %37, %39 : vector<8x32xf32>
    %41 = math.tanh %40 : vector<8x32xf32>
    %42 = vector.extract_strided_slice %14 {offsets = [40, 0], sizes = [8, 32], strides = [1, 1]} : vector<64x32xf32> to vector<8x32xf32>
    %43 = arith.truncf %41 : vector<8x32xf32> to vector<8x32xbf16>
    %cst_16 = arith.constant dense<0.000000e+00> : vector<8x32xf32>
    %44 = tpu.matmul %43, %15, %cst_16 {dimension_numbers = #tpu.dot_dimension_numbers<[1], [0], [0], [1], [0, 0, 1, 1], [], []>} : vector<8x32xbf16>, vector<32x32xbf16>, vector<8x32xf32> -> vector<8x32xf32>
    %45 = arith.addf %42, %44 : vector<8x32xf32>
    %46 = math.tanh %45 : vector<8x32xf32>
    %47 = vector.extract_strided_slice %14 {offsets = [48, 0], sizes = [8, 32], strides = [1, 1]} : vector<64x32xf32> to vector<8x32xf32>
    %48 = arith.truncf %46 : vector<8x32xf32> to vector<8x32xbf16>
    %cst_17 = arith.constant dense<0.000000e+00> : vector<8x32xf32>
    %49 = tpu.matmul %48, %15, %cst_17 {dimension_numbers = #tpu.dot_dimension_numbers<[1], [0], [0], [1], [0, 0, 1, 1], [], []>} : vector<8x32xbf16>, vector<32x32xbf16>, vector<8x32xf32> -> vector<8x32xf32>
    %50 = arith.addf %47, %49 : vector<8x32xf32>
    %51 = math.tanh %50 : vector<8x32xf32>
    %52 = vector.extract_strided_slice %14 {offsets = [56, 0], sizes = [8, 32], strides = [1, 1]} : vector<64x32xf32> to vector<8x32xf32>
    %53 = arith.truncf %51 : vector<8x32xf32> to vector<8x32xbf16>
    %cst_18 = arith.constant dense<0.000000e+00> : vector<8x32xf32>
    %54 = tpu.matmul %53, %15, %cst_18 {dimension_numbers = #tpu.dot_dimension_numbers<[1], [0], [0], [1], [0, 0, 1, 1], [], []>} : vector<8x32xbf16>, vector<32x32xbf16>, vector<8x32xf32> -> vector<8x32xf32>
    %55 = arith.addf %52, %54 : vector<8x32xf32>
    %56 = math.tanh %55 : vector<8x32xf32>
    %57 = arith.truncf %56 : vector<8x32xf32> to vector<8x32xbf16>
    %c0_19 = arith.constant 0 : index
    %c0_20 = arith.constant 0 : index
    %58 = vector.load %arg6[%c0_19, %c0_20] : memref<32x128xbf16, #tpu.memory_space<vmem>>, vector<32x128xbf16>
    %cst_21 = arith.constant dense<0.000000e+00> : vector<8x128xf32>
    %59 = tpu.matmul %57, %58, %cst_21 {dimension_numbers = #tpu.dot_dimension_numbers<[1], [0], [0], [1], [0, 0, 1, 1], [], []>} : vector<8x32xbf16>, vector<32x128xbf16>, vector<8x128xf32> -> vector<8x128xf32>
    %c0_22 = arith.constant 0 : index
    %c0_23 = arith.constant 0 : index
    %60 = vector.load %arg7[%c0_22, %c0_23] : memref<1x128xf32, #tpu.memory_space<vmem>>, vector<1x128xf32>
    %61 = vector.broadcast %60 : vector<1x128xf32> to vector<8x128xf32>
    %62 = arith.addf %59, %61 : vector<8x128xf32>
    %63 = tpu.iota {dimensions = array<i32: 1>} : vector<8x128xi32>
    %c4_i32 = arith.constant 4 : i32
    %64 = vector.broadcast %c4_i32 : i32 to vector<8x128xi32>
    %65 = arith.cmpi slt, %63, %64 : vector<8x128xi32>
    %cst_24 = arith.constant -1.000000e+30 : f32
    %66 = vector.broadcast %cst_24 : f32 to vector<8x128xf32>
    %67 = arith.select %65, %62, %66 : vector<8x128xi1>, vector<8x128xf32>
    %cst_25 = arith.constant dense<0xFF800000> : vector<8xf32>
    %68 = vector.multi_reduction <maximumf>, %67, %cst_25 [1] : vector<8x128xf32> to vector<8xf32>
    %69 = vector.shape_cast %68 : vector<8xf32> to vector<8x1xf32>
    %70 = vector.broadcast %69 : vector<8x1xf32> to vector<8x128xf32>
    %71 = arith.cmpf oeq, %67, %70 : vector<8x128xf32>
    %c128_i32 = arith.constant 128 : i32
    %72 = vector.broadcast %c128_i32 : i32 to vector<8x128xi32>
    %73 = arith.select %71, %63, %72 : vector<8x128xi1>, vector<8x128xi32>
    %cst_26 = arith.constant dense<2147483647> : vector<8xi32>
    %74 = vector.multi_reduction <minsi>, %73, %cst_26 [1] : vector<8x128xi32> to vector<8xi32>
    %75 = vector.shape_cast %74 : vector<8xi32> to vector<8x1xi32>
    %76 = arith.sitofp %75 : vector<8x1xi32> to vector<8x1xf32>
    %77 = vector.broadcast %69 : vector<8x1xf32> to vector<8x128xf32>
    %78 = arith.subf %67, %77 : vector<8x128xf32>
    %79 = math.exp %78 : vector<8x128xf32>
    %cst_27 = arith.constant 0.000000e+00 : f32
    %80 = vector.broadcast %cst_27 : f32 to vector<8x128xf32>
    %81 = arith.select %65, %79, %80 : vector<8x128xi1>, vector<8x128xf32>
    %cst_28 = arith.constant dense<0.000000e+00> : vector<8xf32>
    %82 = vector.multi_reduction <add>, %81, %cst_28 [1] : vector<8x128xf32> to vector<8xf32>
    %83 = vector.shape_cast %82 : vector<8xf32> to vector<8x1xf32>
    %84 = math.log %83 : vector<8x1xf32>
    %85 = arith.addf %69, %84 : vector<8x1xf32>
    %86 = vector.broadcast %85 : vector<8x1xf32> to vector<8x128xf32>
    %87 = arith.subf %67, %86 : vector<8x128xf32>
    %c0_29 = arith.constant 0 : index
    %c0_30 = arith.constant 0 : index
    %88 = vector.load %arg1[%c0_29, %c0_30] : memref<8x1xi32, #tpu.memory_space<vmem>>, vector<8x1xi32>
    %89 = vector.broadcast %88 : vector<8x1xi32> to vector<8x128xi32>
    %90 = arith.cmpi eq, %63, %89 : vector<8x128xi32>
    %cst_31 = arith.constant 0.000000e+00 : f32
    %91 = vector.broadcast %cst_31 : f32 to vector<8x128xf32>
    %92 = arith.select %90, %87, %91 : vector<8x128xi1>, vector<8x128xf32>
    %cst_32 = arith.constant dense<0.000000e+00> : vector<8xf32>
    %93 = vector.multi_reduction <add>, %92, %cst_32 [1] : vector<8x128xf32> to vector<8xf32>
    %94 = vector.shape_cast %93 : vector<8xf32> to vector<8x1xf32>
    %cst_33 = arith.constant 0.000000e+00 : f32
    %95 = vector.broadcast %cst_33 : f32 to vector<8x1xf32>
    %96 = arith.subf %95, %94 : vector<8x1xf32>
    %97 = vector.shape_cast %96 : vector<8x1xf32> to vector<1x8x1xf32>
    %cst_34 = arith.constant dense<0.000000e+00> : vector<1xf32>
    %98 = vector.multi_reduction <add>, %97, %cst_34 [1, 2] : vector<1x8x1xf32> to vector<1xf32>
    %99 = vector.shape_cast %98 : vector<1xf32> to vector<1x1x1xf32>
    %100 = vector.extract %99[0, 0, 0] : f32 from vector<1x1x1xf32>
    %cst_35 = arith.constant 5.000000e-01 : f32
    %101 = arith.mulf %100, %cst_35 : f32
    %cst_36 = arith.constant 0.000000e+00 : f32
    %102 = vector.broadcast %cst_36 : f32 to vector<8x128xf32>
    %103 = arith.select %65, %62, %102 : vector<8x128xi1>, vector<8x128xf32>
    %c4_i32_37 = arith.constant 4 : i32
    %104 = vector.broadcast %c4_i32_37 : i32 to vector<8x128xi32>
    %105 = arith.cmpi eq, %63, %104 : vector<8x128xi32>
    %106 = vector.broadcast %101 : f32 to vector<8x128xf32>
    %107 = arith.select %105, %106, %103 : vector<8x128xi1>, vector<8x128xf32>
    %c5_i32 = arith.constant 5 : i32
    %108 = vector.broadcast %c5_i32 : i32 to vector<8x128xi32>
    %109 = arith.cmpi eq, %63, %108 : vector<8x128xi32>
    %110 = vector.shape_cast %76 : vector<8x1xf32> to vector<8x1xf32>
    %111 = vector.broadcast %110 : vector<8x1xf32> to vector<8x128xf32>
    %112 = arith.select %109, %111, %107 : vector<8x128xi1>, vector<8x128xf32>
    %c0_38 = arith.constant 0 : index
    %c0_39 = arith.constant 0 : index
    %113 = vector.load %arg8[%c0_38, %c0_39] : memref<8x128xf32, #tpu.memory_space<vmem>>, vector<8x128xf32>
    tpu.vector_store %arg8[%c0_38, %c0_39], %112 {strides = array<i32>} : memref<8x128xf32, #tpu.memory_space<vmem>>, vector<8x128xf32>,
    return
  }
}

</mosaic_0001>

<bundles_post_ra>
// kernel: _lambda_.1
= control target key start
LH: loop header
LB: loop body
LE: loop exit
PB: predicated region body
PF: predicated region fallthrough
CT: control target
= control target key end

     0   :  { %v1078_v0 = vmov 0   ;;  %v38_v18 = vlaneseq  ;;  %v1079_v24 = vmov 1.0|1.0   ;;  %v1080_v30 = vmov 0.0   ;;  %s1309_s0 = inlined_call_operand.vmem [shape: s32[64,1], index: 0, kind: input, shape index: {}]   ;;  %s1310_s2 = inlined_call_operand.vmem [shape: bf16[128,32], index: 2, kind: input, shape index: {}]   ;;  %s1311_s3 = inlined_call_operand.vmem [shape: bf16[32,32], index: 3, kind: input, shape index: {}]   ;;  %s1312_s4 = inlined_call_operand.vmem [shape: bf16[32,32], index: 4, kind: input, shape index: {}]   ;;  %s1313_s5 = inlined_call_operand.vmem [shape: f32[1,32], index: 5, kind: input, shape index: {}]   ;;  %s1314_s6 = inlined_call_operand.vmem [shape: bf16[32,128], index: 6, kind: input, shape index: {}]   ;;  %s1315_s7 = inlined_call_operand.vmem [shape: f32[1,128], index: 7, kind: input, shape index: {}]   ;;  %s1316_s1 = inlined_call_operand.vmem [shape: s32[8,1], index: 1, kind: input, shape index: {}]   ;;  %s1317_s8 = inlined_call_operand.vmem [shape: f32[8,128], index: 8, kind: output, shape index: {}]  }
   0x1   :  { %1043 = vset.pattern.permute.xlu1 %v1078_v0  ;;  %1042 = vset.pattern.permute.xlu0 %v1078_v0  ;;  %v32_v1 = vld [vmem:[%s1309_s0 + $0x10] sm:$0xff]  ;;  %v30_v2 = vld [vmem:[%s1309_s0] sm:$0xff]  ;;  %v33_v3 = vld [vmem:[%s1309_s0 + $0x18] sm:$0xff]  ;;  %vm1081_vm12 = vmmov 0   ;;  %vm248_vm13 = vcmask 261120  }
   0x2   :  { %47 = vperm.xlu1 %1043, %v32_v1   ;;  %41 = vperm.xlu0 %1042, %v30_v2   ;;  %v31_v4 = vld [vmem:[%s1309_s0 + $0x8] sm:$0xff]  ;;  %v1044_v5 = vld [vmem:[%s1310_s2] sm:$0xff]   ;;  %v1046_v9 = vld [vmem:[%s1310_s2 + $0x10] sm:$0xff]   ;;  %v1180_v21 = vand.u32 127, %v38_v18 }
   0x3   :  { %v1045_v6 = vld [vmem:[%s1310_s2 + $0x8] sm:$0xff]   ;;  %v34_v8 = vld [vmem:[%s1309_s0 + $0x20] sm:$0xff]  ;;  %928 = vmatprep.subr.bf16.mxu0 %v1044_v5  ;;  %v37_v10 = vld [vmem:[%s1309_s0 + $0x38] sm:$0xff] }
   0x4   :  { %v35_v7 = vld [vmem:[%s1309_s0 + $0x28] sm:$0xff]  ;;  %929 = vmatpush3.bf16.msra.mxu0 %v1044_v5  ;;  %v36_v11 = vld [vmem:[%s1309_s0 + $0x30] sm:$0xff]  ;;  %v1047_v12 = vld [vmem:[%s1310_s2 + $0x18] sm:$0xff]   ;;  %vm776_vm14 = vcmp.lt.s32.totalorder %v1180_v21, 4 }
   0x5   :  { %930 = vmatprep.subr.bf16.mxu0 %v1045_v6  ;;  %v1048_v13 = vld [vmem:[%s1310_s2 + $0x20] sm:$0xff]   ;;  %v1049_v15 = vld [vmem:[%s1310_s2 + $0x28] sm:$0xff]   ;;  %v1050_v16 = vld [vmem:[%s1310_s2 + $0x30] sm:$0xff]  }
   0x6   :  { %50 = vperm.xlu1 %1043, %v33_v3   ;;  %44 = vperm.xlu0 %1042, %v31_v4   ;;  %v1052_v14 = vld [vmem:[%s1311_s3] sm:$0xff]   ;;  %v1051_v17 = vld [vmem:[%s1310_s2 + $0x38] sm:$0xff]   ;;  %v1053_v29 = vld [vmem:[%s1311_s3 + $0x8] sm:$0xff]  }
   0x7   :  { %952 = vmatprep.subr.bf16.mxu1 %v1052_v14  ;;  %v1198_v31 = vld [vmem:[%s1312_s4] sm:$0xff]   ;;  %v1205_v32 = vld [vmem:[%s1312_s4 + $0x8] sm:$0xff]  }
   0x8   :  { %931 = vmatpush3.bf16.msra.mxu0 %v1045_v6  ;;  %953 = vmatpush3.bf16.msra.mxu1 %v1052_v14  ;;  %v863_v45 = vld [vmem:[%s1313_s5] ss:$0 sm:$0xff] }
   0x9   :  { %932 = vmatprep.subr.bf16.mxu0 %v1046_v9  ;;  %954 = vmatprep.subr.bf16.mxu1 %v1053_v29 }
   0xa   :  { %56 = vperm.xlu1 %1043, %v35_v7   ;;  %53 = vperm.xlu0 %1042, %v34_v8  }
   0xc   :  { %933 = vmatpush3.bf16.msra.mxu0 %v1046_v9  ;;  %955 = vmatpush3.bf16.msra.mxu1 %v1053_v29 }
   0xd   :  { %934 = vmatprep.subr.bf16.mxu0 %v1047_v12  ;;  %964 = vmatprep.subr.bf16.mxu1 %v1080_v30 }
   0xe   :  { %62 = vperm.xlu1 %1043, %v37_v10   ;;  %59 = vperm.xlu0 %1042, %v36_v11  }
  0x10   :  { %935 = vmatpush3.bf16.msra.mxu0 %v1047_v12 }
  0x11   :  { %936 = vmatprep.subr.bf16.mxu0 %v1048_v13 }
  0x14   :  { %937 = vmatpush3.bf16.msra.mxu0 %v1048_v13 }
  0x15   :  { %938 = vmatprep.subr.bf16.mxu0 %v1049_v15 }
  0x18   :  { %939 = vmatpush3.bf16.msra.mxu0 %v1049_v15 }
  0x19   :  { %940 = vmatprep.subr.bf16.mxu0 %v1050_v16 }
  0x1c   :  { %941 = vmatpush3.bf16.msra.mxu0 %v1050_v16 }
  0x1d   :  { %942 = vmatprep.subr.bf16.mxu0 %v1051_v17 }
  0x20   :  { %943 = vmatpush3.bf16.msra.mxu0 %v1051_v17 }
  0x21   :  { %988 = vmatprep.subr.bf16.mxu0 %v1080_v30 }
  0x81   :  { %v48_v19 = vpop.permute.xlu1 %47  ;;  %v42_v20 = vpop.permute.xlu0 %41 }
  0x82   :  { %vm66_vm0 = vcmp.eq.s32.totalorder %v1180_v21, %v48_v19  ;;  %vm64_vm3 = vcmp.eq.s32.totalorder %v1180_v21, %v42_v20 }
  0x85   :  { %v51_v22 = vpop.permute.xlu1 %50  ;;  %v45_v23 = vpop.permute.xlu0 %44 }
  0x86   :  { %vm67_vm1 = vcmp.eq.s32.totalorder %v1180_v21, %v51_v22  ;;  %vm65_vm2 = vcmp.eq.s32.totalorder %v1180_v21, %v45_v23 }
  0x87   :  { %vm857_vm4 = vmpackc.low %vm67_vm1, %vm66_vm0  ;;  %vm816_vm1 = vcmask 7168  }
  0x88   :  { %vm855_vm5 = vmpackc.low %vm65_vm2, %vm64_vm3  ;;  %vm829_vm3 = vcmp.eq.s32.totalorder %v1180_v21, 4 }
  0x89   :  { %944 = vmatprep.mubr.msk.bf16.mxu0 %vm855_vm5, %v1079_v24  ;;  %v57_v25 = vpop.permute.xlu1 %56  ;;  %v54_v26 = vpop.permute.xlu0 %53 }
  0x8a   :  { %vm69_vm6 = vcmp.eq.s32.totalorder %v1180_v21, %v57_v25  ;;  %945 = vmatmul.mubr.msk.bf16.vlgmr.msra.gmra.mrb[0].mxu0 %vm857_vm4, %v1079_v24  ;;  %vm68_vm7 = vcmp.eq.s32.totalorder %v1180_v21, %v54_v26  ;;  %vm832_vm4 = vcmp.eq.s32.totalorder %v1180_v21, 5 }
  0x8b   :  { %vm859_vm8 = vmpackc.low %vm69_vm6, %vm68_vm7  ;;  %989 = vmatpush3.bf16.msra.mxu0 %v1198_v31 }
  0x8c   :  { %948 = vmatprep.mubr.msk.bf16.mxu0 %vm859_vm8, %v1079_v24  ;;  %990 = vmatprep.subr.bf16.mxu0 %v1080_v30 }
  0x8d   :  { %v63_v27 = vpop.permute.xlu1 %62  ;;  %v60_v28 = vpop.permute.xlu0 %59 }
  0x8e   :  { %vm71_vm9 = vcmp.eq.s32.totalorder %v1180_v21, %v63_v27  ;;  %vm70_vm10 = vcmp.eq.s32.totalorder %v1180_v21, %v60_v28 }
  0x8f   :  { %vm861_vm11 = vmpackc.low %vm71_vm9, %vm70_vm10  ;;  %991 = vmatpush3.bf16.msra.mxu0 %v1205_v32 }
  0x90   :  { %1004 = vmatprep.subr.bf16.mxu0 %v1080_v30 }
  0x92   :  { %949 = vmatmul.mubr.msk.bf16.gmra.mrb[4].mxu0 %vm861_vm11, %v1079_v24 }
  0x93   :  { %992 = vmatprep.mubr.msk.bf16.mxu0 %vm1081_vm12, %v1080_v30 }
 0x15d   :  { %v946_v33 = vpop.f32.mrb[0].mxu0 }
 0x15e   :  { %v190_v34 = vpop.f32.mrb[1].mxu0 }
 0x15f   :  { %v947_v35 = vpop.f32.mrb[2].mxu0 }
 0x160   :  { %v222_v36 = vpack.c.bf16 %v947_v35, %v946_v33  ;;  %v193_v37 = vpop.f32.mrb[3].mxu0 }
 0x161   :  { %v221_v38 = vpack.c.bf16 %v193_v37, %v190_v34 }
 0x163   :  { %956 = vmatprep.mubr.msk.bf16.mxu1 %vm248_vm13, %v221_v38 }
 0x164   :  { %957 = vmatmul.mubr.msk.bf16.vlgmr.msra.gmra.mrb[0].mxu1 %vm248_vm13, %v222_v36 }
 0x165   :  { %965 = vmatpush3.bf16.msra.mxu1 %v1198_v31  ;;  %v950_v39 = vpop.f32.mrb[4].mxu0 }
 0x166   :  { %v206_v40 = vpop.f32.mrb[5].mxu0  ;;  %966 = vmatprep.subr.bf16.mxu1 %v1080_v30 }
 0x167   :  { %v951_v41 = vpop.f32.mrb[6].mxu0 }
 0x168   :  { %v224_v42 = vpack.c.bf16 %v951_v41, %v950_v39  ;;  %v209_v43 = vpop.f32.mrb[7].mxu0 }
 0x169   :  { %v223_v44 = vpack.c.bf16 %v209_v43, %v206_v40  ;;  %967 = vmatpush3.bf16.msra.mxu1 %v1205_v32 }
 0x16a   :  { %972 = vmatprep.subr.bf16.mxu1 %v1080_v30 }
 0x16b   :  { %960 = vmatprep.mubr.msk.bf16.mxu1 %vm248_vm13, %v223_v44 }
 0x16c   :  { %961 = vmatmul.mubr.msk.bf16.gmra.mrb[4].mxu1 %vm248_vm13, %v224_v42 }
 0x16d   :  { %968 = vmatprep.mubr.msk.bf16.mxu1 %vm1081_vm12, %v1080_v30 }
 0x174   :  { %969 = vmatmul.mubr.bf16.vlgmr.msra.gmra.mrb[8].mxu1 %v1078_v0 }
 0x175   :  { %973 = vmatpush3.bf16.msra.mxu1 %v1198_v31  ;;  %976 = vmatprep.mubr.msk.bf16.mxu1 %vm1081_vm12, %v1080_v30 }
 0x176   :  { %974 = vmatprep.subr.bf16.mxu1 %v1080_v30 }
 0x179   :  { %975 = vmatpush3.bf16.msra.mxu1 %v1205_v32 }
 0x17a   :  { %980 = vmatprep.subr.bf16.mxu1 %v1080_v30 }
 0x237   :  { %v958_v46 = vpop.f32.mrb[0].mxu1 }
 0x238   :  { %v304_v47 = vadd.f32 %v958_v46, %v863_v45  ;;  %v295_v48 = vpop.f32.mrb[1].mxu1 }
 0x239   :  { %v959_v49 = vpop.f32.mrb[2].mxu1  ;;  %v296_v61 = vadd.f32 %v863_v45, %v295_v48 }
 0x23a   :  { %v307_v50 = vadd.f32 %v959_v49, %v863_v45  ;;  %v298_v51 = vpop.f32.mrb[3].mxu1  ;;  %v1056_v49 = vld [vmem:[%s1314_s6] sm:$0xff]  }
 0x23b   :  { %v299_v52 = vadd.f32 %v863_v45, %v298_v51 }
 0x23f   :  { %v962_v53 = vpop.f32.mrb[4].mxu1 }
 0x240   :  { %v1231_v54 = vadd.f32 %v962_v53, %v863_v45  ;;  %v311_v55 = vpop.f32.mrb[5].mxu1 }
 0x241   :  { %v1233_v56 = vadd.f32 %v863_v45, %v311_v55  ;;  %v963_v57 = vpop.f32.mrb[6].mxu1 }
 0x242   :  { %v1235_v58 = vadd.f32 %v963_v57, %v863_v45  ;;  %v314_v59 = vpop.f32.mrb[7].mxu1 }
 0x243   :  { %v1237_v60 = vadd.f32 %v863_v45, %v314_v59 }
 0x247   :  { %v379_v62 = vpop.f32.mrb[8].mxu1 }
 0x248   :  { %v385_v63 = vadd.f32 %v379_v62, %v296_v61  ;;  %v970_v0 = vpop.f32.mrb[9].mxu1 }
 0x249   :  { %v382_v1 = vpop.f32.mrb[10].mxu1  ;;  %v807_v0 = vld [vmem:[%s1316_s1] sm:$0xff] }
 0x24a   :  { %1058 = vtanh.f32 %v385_v63  ;;  %v971_v2 = vpop.f32.mrb[11].mxu1 }
 0x254   :  { %v1059_v3 = vpop.eup %1058 }
 0x255   :  { %v387_v4 = vpack.c.bf16 %v1059_v3, %v1059_v3 }
 0x257   :  { %977 = vmatmul.mubr.msk.bf16.vlgmr.msra.gmra.mrb[12].mxu1 %vm248_vm13, %v387_v4 }
 0x258   :  { %981 = vmatpush3.bf16.msra.mxu1 %v1198_v31  ;;  %984 = vmatprep.mubr.msk.bf16.mxu1 %vm1081_vm12, %v1080_v30 }
 0x259   :  { %982 = vmatprep.subr.bf16.mxu1 %v1080_v30 }
 0x25c   :  { %983 = vmatpush3.bf16.msra.mxu1 %v1205_v32 }
 0x25d   :  { %996 = vmatprep.subr.bf16.mxu1 %v1080_v30 }
 0x32a   :  { %v425_v5 = vpop.f32.mrb[12].mxu1 }
 0x32b   :  { %v431_v6 = vadd.f32 %v425_v5, %v299_v52  ;;  %v978_v7 = vpop.f32.mrb[13].mxu1 }
 0x32c   :  { %v428_v8 = vpop.f32.mrb[14].mxu1 }
 0x32d   :  { %1060 = vtanh.f32 %v431_v6  ;;  %v979_v9 = vpop.f32.mrb[15].mxu1 }
 0x337   :  { %v1061_v10 = vpop.eup %1060 }
 0x338   :  { %v433_v11 = vpack.c.bf16 %v1061_v10, %v1061_v10 }
 0x33a   :  { %985 = vmatmul.mubr.msk.bf16.vlgmr.msra.gmra.mrb[16].mxu1 %vm248_vm13, %v433_v11 }
 0x33b   :  { %997 = vmatpush3.bf16.msra.mxu1 %v1198_v31  ;;  %1000 = vmatprep.mubr.msk.bf16.mxu1 %vm1081_vm12, %v1080_v30 }
 0x33c   :  { %998 = vmatprep.subr.bf16.mxu1 %v1080_v30 }
 0x33f   :  { %999 = vmatpush3.bf16.msra.mxu1 %v1205_v32 }
 0x340   :  { %1012 = vmatprep.subr.bf16.mxu1 %v1080_v30 }
 0x40d   :  { %v471_v12 = vpop.f32.mrb[16].mxu1 }
 0x40e   :  { %v477_v13 = vadd.f32 %v471_v12, %v304_v47  ;;  %v986_v14 = vpop.f32.mrb[17].mxu1 }
 0x40f   :  { %v474_v15 = vpop.f32.mrb[18].mxu1 }
 0x410   :  { %1062 = vtanh.f32 %v477_v13  ;;  %v987_v16 = vpop.f32.mrb[19].mxu1 }
 0x41a   :  { %v1063_v17 = vpop.eup %1062 }
 0x41b   :  { %v479_v18 = vpack.c.bf16 %v1063_v17, %v1063_v17 }
 0x41d   :  { %993 = vmatmul.mubr.msk.bf16.vlgmr.msra.gmra.mrb[8].mxu0 %vm248_vm13, %v479_v18 }
 0x41e   :  { %1005 = vmatpush3.bf16.msra.mxu0 %v1198_v31  ;;  %1008 = vmatprep.mubr.msk.bf16.mxu0 %vm1081_vm12, %v1080_v30 }
 0x41f   :  { %1006 = vmatprep.subr.bf16.mxu0 %v1080_v30 }
 0x422   :  { %1007 = vmatpush3.bf16.msra.mxu0 %v1205_v32 }
 0x423   :  { %1020 = vmatprep.subr.bf16.mxu0 %v1080_v30 }
 0x4f0   :  { %v517_v19 = vpop.f32.mrb[8].mxu0 }
 0x4f1   :  { %v523_v20 = vadd.f32 %v517_v19, %v307_v50  ;;  %v994_v22 = vpop.f32.mrb[9].mxu0  ;;  %v1057_v50 = vld [vmem:[%s1314_s6 + $0x8] sm:$0xff]  }
 0x4f2   :  { %v520_v23 = vpop.f32.mrb[10].mxu0 }
 0x4f3   :  { %1064 = vtanh.f32 %v523_v20  ;;  %v995_v24 = vpop.f32.mrb[11].mxu0 }
 0x4fd   :  { %v1065_v25 = vpop.eup %1064 }
 0x4fe   :  { %v525_v26 = vpack.c.bf16 %v1065_v25, %v1065_v25 }
 0x500   :  { %1001 = vmatmul.mubr.msk.bf16.vlgmr.msra.gmra.mrb[20].mxu1 %vm248_vm13, %v525_v26 }
 0x501   :  { %1013 = vmatpush3.bf16.msra.mxu1 %v1198_v31  ;;  %1016 = vmatprep.mubr.msk.bf16.mxu1 %vm1081_vm12, %v1080_v30 }
 0x502   :  { %1014 = vmatprep.subr.bf16.mxu1 %v1080_v30 }
 0x505   :  { %1015 = vmatpush3.bf16.msra.mxu1 %v1205_v32 }
 0x506   :  { %1028 = vmatprep.subr.bf16.mxu1 %v1080_v30 }
 0x5d3   :  { %v563_v27 = vpop.f32.mrb[20].mxu1 }
 0x5d4   :  { %v569_v28 = vadd.f32 %v563_v27, %v1233_v56  ;;  %v1002_v29 = vpop.f32.mrb[21].mxu1 }
 0x5d5   :  { %v566_v33 = vpop.f32.mrb[22].mxu1 }
 0x5d6   :  { %1066 = vtanh.f32 %v569_v28  ;;  %v1003_v34 = vpop.f32.mrb[23].mxu1 }
 0x5e0   :  { %v1067_v35 = vpop.eup %1066 }
 0x5e1   :  { %v571_v36 = vpack.c.bf16 %v1067_v35, %v1067_v35 }
 0x5e3   :  { %1009 = vmatmul.mubr.msk.bf16.vlgmr.msra.gmra.mrb[12].mxu0 %vm248_vm13, %v571_v36 }
 0x5e4   :  { %1021 = vmatpush3.bf16.msra.mxu0 %v1198_v31  ;;  %1024 = vmatprep.mubr.msk.bf16.mxu0 %vm1081_vm12, %v1080_v30 }
 0x5e5   :  { %1022 = vmatprep.subr.bf16.mxu0 %v1080_v30 }
 0x5e8   :  { %1023 = vmatpush3.bf16.msra.mxu0 %v1205_v32 }
 0x6b6   :  { %v609_v37 = vpop.f32.mrb[12].mxu0 }
 0x6b7   :  { %v615_v38 = vadd.f32 %v609_v37, %v1237_v60  ;;  %v1010_v39 = vpop.f32.mrb[13].mxu0 }
 0x6b8   :  { %v612_v40 = vpop.f32.mrb[14].mxu0 }
 0x6b9   :  { %1068 = vtanh.f32 %v615_v38  ;;  %v1011_v41 = vpop.f32.mrb[15].mxu0 }
 0x6c3   :  { %v1069_v42 = vpop.eup %1068 }
 0x6c4   :  { %v617_v43 = vpack.c.bf16 %v1069_v42, %v1069_v42 }
 0x6c6   :  { %1017 = vmatmul.mubr.msk.bf16.vlgmr.msra.gmra.mrb[24].mxu1 %vm248_vm13, %v617_v43 }
 0x6c7   :  { %1032 = vmatprep.mubr.msk.bf16.mxu1 %vm1081_vm12, %v1080_v30  ;;  %1029 = vmatpush3.bf16.msra.mxu1 %v1056_v49 }
 0x6c8   :  { %1030 = vmatprep.subr.bf16.mxu1 %v1080_v30  ;;  %v879_v30 = vld [vmem:[%s1315_s7] ss:$0 sm:$0xff] }
 0x6cb   :  { %1031 = vmatpush3.bf16.msra.mxu1 %v1057_v50 }
 0x799   :  { %v655_v31 = vpop.f32.mrb[24].mxu1 }
 0x79a   :  { %v661_v44 = vadd.f32 %v655_v31, %v1231_v54  ;;  %v1018_v45 = vpop.f32.mrb[25].mxu1 }
 0x79b   :  { %v658_v46 = vpop.f32.mrb[26].mxu1 }
 0x79c   :  { %1070 = vtanh.f32 %v661_v44  ;;  %v1019_v32 = vpop.f32.mrb[27].mxu1 }
 0x7a6   :  { %v1071_v47 = vpop.eup %1070 }
 0x7a7   :  { %v663_v48 = vpack.c.bf16 %v1071_v47, %v1071_v47 }
 0x7a9   :  { %1025 = vmatmul.mubr.msk.bf16.vlgmr.msra.gmra.mrb[16].mxu0 %vm248_vm13, %v663_v48 }
 0x87c   :  { %v701_v51 = vpop.f32.mrb[16].mxu0 }
 0x87d   :  { %v707_v52 = vadd.f32 %v701_v51, %v1235_v58  ;;  %v1026_v53 = vpop.f32.mrb[17].mxu0 }
 0x87e   :  { %v704_v54 = vpop.f32.mrb[18].mxu0 }
 0x87f   :  { %1072 = vtanh.f32 %v707_v52  ;;  %v1027_v55 = vpop.f32.mrb[19].mxu0 }
 0x889   :  { %v1073_v56 = vpop.eup %1072 }
 0x88a   :  { %v709_v57 = vpack.c.bf16 %v1073_v56, %v1073_v56 }
 0x88c   :  { %1033 = vmatmul.mubr.msk.bf16.vlgmr.msra.gmra.mrb[28].mxu1 %vm248_vm13, %v709_v57 }
 0x95f   :  { %v770_v59 = vpop.f32.mrb[28].mxu1 }
 0x960   :  { %v771_v60 = vadd.f32 %v879_v30, %v770_v59  ;;  %v1034_v61 = vpop.f32.mrb[29].mxu1 }
 0x961   :  { %v773_v62 = vpop.f32.mrb[30].mxu1 }
 0x962   :  { %v777_v58 = vsel %vm776_vm14, %v771_v60, -1e+30  ;;  %v1035_v63 = vpop.f32.mrb[31].mxu1  ;;  %v828_v39 = vsel %vm776_vm14, %v771_v60, 0.0 }
 0x963   :  { %778 = vmax.xlane.f32.xlu0 %v777_v58 }
 0x979   :  { %809 = vperm.xlu0 %1042, %v807_v0  }
 0x9f0   :  { %v779_v1 = vpop.xlane.xlu0 %778 }
 0x9f1   :  { %v797_v2 = vsub.f32 %v777_v58, %v779_v1  ;;  %vm780_vm15 = vcmp.eq.f32.partialorder %v777_v58, %v779_v1 }
 0x9f2   :  { %v781_v11 = vsel %vm780_vm15, %v1180_v21, 128 }
 0x9f3   :  { %v798_v3 = vmul.f32 1.442695, %v797_v2  ;;  %v783_v13 = vshra.s32 %v781_v11, 16  ;;  %v782_v17 = vand.u32 65535, %v781_v11 }
 0x9f5   :  { %1074 = vpow2.f32 %v798_v3  ;;  %v785_v15 = vcvt.s32.f32 %v783_v13  ;;  %v784_v22 = vcvt.s32.f32 %v782_v17 }
 0x9f8   :  { %v810_v9 = vpop.permute.xlu0 %809 }
 0x9f9   :  { %vm811_vm0 = vcmp.eq.s32.totalorder %v1180_v21, %v810_v9 }
 0x9ff   :  { %v1075_v4 = vpop.eup %1074 }
 0xa00   :  { %v800_v5 = vsel %vm776_vm14, %v1075_v4, 0.0 }
 0xa01   :  { %801 = vadd.xlane.f32.xlu1 %v800_v5 }
 0xa8e   :  { %v802_v6 = vpop.xlane.xlu1 %801 }
 0xa8f   :  { %1076 = vlog2.f32 %v802_v6 }
 0xa99   :  { %v1077_v7 = vpop.eup %1076 }
 0xa9a   :  { %v804_v8 = vmul.f32 0.6931472, %v1077_v7 }
 0xa9c   :  { %v805_v10 = vadd.f32 %v804_v8, %v779_v1 }
 0xa9e   :  { %v806_v12 = vsub.f32 %v777_v58, %v805_v10 }
 0xaa0   :  { %v812_v14 = vsel %vm811_vm0, %v806_v12, 0.0 }
 0xaa1   :  { %813 = vadd.xlane.f32.xlu1 %v812_v14 }
 0xaa5   :  { %786 = vmin.xlane.f32.xlu1 %v785_v15 }
 0xb2e   :  { %v814_v16 = vpop.xlane.xlu1 %813 }
 0xb2f   :  { %v815_v18 = vsub.f32 0.0, %v814_v16 }
 0xb31   :  { %v817_v19 = vsel %vm816_vm1, %v815_v18, 0.0 }
 0xb32   :  { %818 = vadd.xlane.f32.xlu1 %v817_v19  ;;  %v787_v20 = vpop.xlane.xlu1 %786 }
 0xb33   :  { %vm788_vm2 = vcmp.eq.f32.partialorder %v785_v15, %v787_v20  ;;  %v793_v35 = vcvt.f32.s32 %v787_v20 }
 0xb34   :  { %v789_v23 = vsel %vm788_vm2, %v784_v22, inf }
 0xb35   :  { %v794_v37 = vshll.u32 %v793_v35, 16 }
 0xb36   :  { %790 = vmin.xlane.f32.xlu1 %v789_v23 }
 0xbbf   :  { %v819_v24 = vpop.xlane.xlu1 %818 }
 0xbc0   :  { %v820_v25 = vrot.slane %v819_v24, 4 }
 0xbc2   :  { %v821_v26 = vadd.f32 %v820_v25, %v819_v24 }
 0xbc3   :  { %v791_v34 = vpop.xlane.xlu1 %790 }
 0xbc4   :  { %v822_v27 = vrot.slane %v821_v26, 2  ;;  %v792_v36 = vcvt.f32.s32 %v791_v34 }
 0xbc6   :  { %v823_v28 = vadd.f32 %v822_v27, %v821_v26  ;;  %v795_v38 = vadd.s32 %v794_v37, %v792_v36 }
 0xbc8   :  { %v824_v29 = vrot.slane %v823_v28, 1  ;;  %v796_v40 = vcvt.s32.f32 %v795_v38 }
 0xbca   :  { %v825_v33 = vadd.f32 %v824_v29, %v823_v28 }
 0xbcc   :  { %1036 = vpush %v825_v33 }
 0xbfd   :  { %s1037_s1 = spop %1036 }
 0xbfe   :  { %s827_s7 = smul.f32 0.5, %s1037_s1 }
 0xc00   :  { %v830_v41 = vstv %s827_s7 }
 0xc01   :  { %v831_v42 = vsel %vm829_vm3, %v830_v41, %v828_v39 }
 0xc02   :  { %v833_v43 = vsel %vm832_vm4, %v796_v40, %v831_v42 }
 0xc03   :  { %834 = vst [vmem:[%s1317_s8] sm:$0xff] %v833_v43 }

</bundles_post_ra>
